<compile_context>
chip_gen: v5e
topology: v5e:2x2
jax: 0.10.0
libtpu: 0.0.40
codegen_flags: <defaults>
</compile_context>

<pallas_src>
import functools

import jax
import jax.numpy as jnp
from jax.experimental import pallas as pl
from jax.experimental.pallas import tpu as pltpu

LANE = 128
SUBLANE = 8
MAX_ROW_TILE = 2048   # (2048, 128) f32 block = 1 MiB -> 2 MiB double-buffered
NUM_SHARDS = 2        # leading "parallel" grid axis (megacore on v7x)


def _one_sided_kernel(x_ref, part_ref, acc_ref, *,
                      n_rows, row_tile, steps_per_shard, needs_mask):
    c = pl.program_id(0)   # shard index (parallel)
    j = pl.program_id(1)   # reduction step within shard (arbitrary)

    @pl.when(j == 0)
    def _():
        acc_ref[...] = jnp.zeros_like(acc_ref)

    x = x_ref[...].astype(jnp.float32)
    contrib = jnp.maximum(-x, 0.0)           # relu(-x), pure VPU

    if needs_mask:
        # Mask rows past the true row count. Covers the ragged last tile and
        # shards whose (clamped) blocks lie entirely past the end of the slab.
        block_idx = c * steps_per_shard + j  # UNclamped logical block index
        row_ids = block_idx * row_tile + jax.lax.broadcasted_iota(
            jnp.int32, (row_tile, LANE), 0)
        contrib = jnp.where(row_ids < n_rows, contrib, 0.0)

    # Deferred reduction: elementwise accumulate only (no XLU / SMEM round-trip
    # in the steady state).
    acc_ref[...] += contrib

    @pl.when(j == steps_per_shard - 1)
    def _():
        part_ref[0, 0] = jnp.sum(acc_ref[...])   # one reduce per shard


def one_sided(x):
    """Computes -mean(relu(-x)) over all elements of x (any shape)."""
    count = x.size
    if count == 0:
        return jnp.float32(jnp.nan)  # matches torch .mean() on empty input

    flat = x.reshape(-1)  # keep native dtype; kernel casts per tile
    slab = SUBLANE * LANE  # 1024
    rem = flat.shape[0] % slab
    if rem:
        # Small zero-pad only in the ragged case (zeros are neutral: relu(-0)=0).
        flat = jnp.pad(flat, (0, slab - rem))
    x2d = flat.reshape(-1, LANE)          # (rows, 128), rows % 8 == 0
    n_rows = x2d.shape[0]

    row_tile = min(MAX_ROW_TILE, n_rows)  # multiple of 8
    total_steps = pl.cdiv(n_rows, row_tile)
    num_shards = min(NUM_SHARDS, total_steps)
    steps_per_shard = pl.cdiv(total_steps, num_shards)
    needs_mask = (n_rows % row_tile != 0) or (
        num_shards * steps_per_shard != total_steps)

    def in_index_map(c, j):
        b = c * steps_per_shard + j
        # Clamp so the DMA never targets a block fully past the array; masked
        # rows contribute 0 regardless of what gets (re)read.
        return (jnp.minimum(b, total_steps - 1), 0)

    partials = pl.pallas_call(
        functools.partial(
            _one_sided_kernel,
            n_rows=n_rows,
            row_tile=row_tile,
            steps_per_shard=steps_per_shard,
            needs_mask=needs_mask,
        ),
        out_shape=jax.ShapeDtypeStruct((num_shards, 1), jnp.float32),
        grid_spec=pltpu.PrefetchScalarGridSpec(
            num_scalar_prefetch=0,
            grid=(num_shards, steps_per_shard),
            in_specs=[pl.BlockSpec((row_tile, LANE), in_index_map)],
            out_specs=pl.BlockSpec(
                (1, 1), lambda c, j: (c, 0), memory_space=pltpu.SMEM
            ),
            scratch_shapes=[pltpu.VMEM((row_tile, LANE), jnp.float32)],
        ),
        compiler_params=pltpu.CompilerParams(
            dimension_semantics=("parallel", "arbitrary")
        ),
    )(x2d)

    return -jnp.sum(partials) / jnp.float32(count)


def one_sided_ref(x):
    return -jnp.mean(jnp.maximum(-x.astype(jnp.float32), 0.0))


if __name__ == "__main__":
    key = jax.random.PRNGKey(0)
    shapes = [
        (2, 4, 16, 16),    # primary NCHW test shape (single tile path)
        (4, 16, 64, 96),   # 3072 rows: exercises sharding + ragged-tile mask
        (3, 5, 7, 11),     # non-multiple-of-1024 element count: small-pad path
    ]
    for i, shape in enumerate(shapes):
        x = jax.random.normal(jax.random.fold_in(key, i), shape,
                              dtype=jnp.float32)
        out = jax.block_until_ready(one_sided(x))
        ref = jax.block_until_ready(one_sided_ref(x))
        assert jnp.allclose(out, ref, rtol=1e-5, atol=1e-6), (shape, out, ref)
    print("KERNEL_OK")
</pallas_src>

<mosaic_0001>
module attributes {stable_mosaic.version = 11 : i64} {
  func.func @_one_sided_kernel(%arg0: i32, %arg1: i32, %arg2: memref<16x128xf32, #tpu.memory_space<vmem>>, %arg3: memref<1x1xf32, #tpu.memory_space<smem>>, %arg4: memref<16x128xf32, #tpu.memory_space<vmem>>) attributes {dimension_semantics = [#tpu.dimension_semantics<parallel>, #tpu.dimension_semantics<arbitrary>], iteration_bounds = array<i64: 1, 1>, scalar_prefetch = 0 : i64, scratch_operands = 1 : i64, tpu.core_type = #tpu.core_type<tc>, window_params = [{transform_indices = @transform_0, window_bounds = array<i64: 16, 128>}, {transform_indices = @transform_1, window_bounds = array<i64: 1, 1>}]} {
    %c0_i32 = arith.constant 0 : i32
    %0 = arith.cmpi eq, %arg1, %c0_i32 : i32
    %1 = arith.extui %0 : i1 to i32
    %c0_i32_0 = arith.constant 0 : i32
    %2 = arith.cmpi ne, %1, %c0_i32_0 : i32
    scf.if %2 {
      %cst_9 = arith.constant 0.000000e+00 : f32
      %14 = vector.broadcast %cst_9 : f32 to vector<16x128xf32>
      %c0_10 = arith.constant 0 : index
      %c0_11 = arith.constant 0 : index
      %15 = vector.load %arg4[%c0_10, %c0_11] : memref<16x128xf32, #tpu.memory_space<vmem>>, vector<16x128xf32>
      tpu.vector_store %arg4[%c0_10, %c0_11], %14 {strides = array<i32>} : memref<16x128xf32, #tpu.memory_space<vmem>>, vector<16x128xf32>,
    } else {
    }
    %c0 = arith.constant 0 : index
    %c0_1 = arith.constant 0 : index
    %3 = vector.load %arg2[%c0, %c0_1] : memref<16x128xf32, #tpu.memory_space<vmem>>, vector<16x128xf32>
    %cst = arith.constant 0.000000e+00 : f32
    %4 = vector.broadcast %cst : f32 to vector<16x128xf32>
    %5 = arith.subf %4, %3 : vector<16x128xf32>
    %cst_2 = arith.constant 0.000000e+00 : f32
    %6 = vector.broadcast %cst_2 : f32 to vector<16x128xf32>
    %7 = arith.maximumf %5, %6 : vector<16x128xf32>
    %c0_3 = arith.constant 0 : index
    %c0_4 = arith.constant 0 : index
    %8 = vector.load %arg4[%c0_3, %c0_4] : memref<16x128xf32, #tpu.memory_space<vmem>>, vector<16x128xf32>
    %9 = arith.addf %8, %7 : vector<16x128xf32>
    %c0_5 = arith.constant 0 : index
    %c0_6 = arith.constant 0 : index
    %10 = vector.load %arg4[%c0_5, %c0_6] : memref<16x128xf32, #tpu.memory_space<vmem>>, vector<16x128xf32>
    tpu.vector_store %arg4[%c0_5, %c0_6], %9 {strides = array<i32>} : memref<16x128xf32, #tpu.memory_space<vmem>>, vector<16x128xf32>,
    %c0_i32_7 = arith.constant 0 : i32
    %11 = arith.cmpi eq, %arg1, %c0_i32_7 : i32
    %12 = arith.extui %11 : i1 to i32
    %c0_i32_8 = arith.constant 0 : i32
    %13 = arith.cmpi ne, %12, %c0_i32_8 : i32
    scf.if %13 {
      %c0_9 = arith.constant 0 : index
      %c0_10 = arith.constant 0 : index
      %14 = vector.load %arg4[%c0_9, %c0_10] : memref<16x128xf32, #tpu.memory_space<vmem>>, vector<16x128xf32>
      %15 = vector.shape_cast %14 : vector<16x128xf32> to vector<1x16x128xf32>
      %cst_11 = arith.constant dense<0.000000e+00> : vector<1xf32>
      %16 = vector.multi_reduction <add>, %15, %cst_11 [1, 2] : vector<1x16x128xf32> to vector<1xf32>
      %17 = vector.shape_cast %16 : vector<1xf32> to vector<1x1x1xf32>
      %18 = vector.extract %17[0, 0, 0] : f32 from vector<1x1x1xf32>
      %c0_12 = arith.constant 0 : index
      %c0_13 = arith.constant 0 : index
      %19 = memref.load %arg3[%c0_12, %c0_13] : memref<1x1xf32, #tpu.memory_space<smem>>
      memref.store %18, %arg3[%c0_12, %c0_13] : memref<1x1xf32, #tpu.memory_space<smem>>
    } else {
    }
    return
  }
  func.func @transform_0(%arg0: i32, %arg1: i32) -> (i32, i32) {
    %c1_i32 = arith.constant 1 : i32
    %0 = arith.muli %arg0, %c1_i32 : i32
    %1 = arith.addi %0, %arg1 : i32
    %c0_i32 = arith.constant 0 : i32
    %2 = arith.minsi %1, %c0_i32 : i32
    %c0_i32_0 = arith.constant 0 : i32
    %c0_i32_1 = arith.constant 0 : i32
    return %2, %c0_i32_0 : i32, i32
  }
  func.func @transform_1(%arg0: i32, %arg1: i32) -> (i32, i32) {
    %c0_i32 = arith.constant 0 : i32
    %c0_i32_0 = arith.constant 0 : i32
    return %arg0, %c0_i32 : i32, i32
  }
}

</mosaic_0001>

<bundles_post_ra>
// kernel: tpu_custom_call.1
= control target key start
LH: loop header
LB: loop body
LE: loop exit
PB: predicated region body
PF: predicated region fallthrough
CT: control target
= control target key end

     0   :  { %6 = vsyncpa [#allocation4], 0  ;;  %s154_s0 = inlined_call_operand.hbm [shape: f32[16,128], index: 0, kind: input, shape index: {}]   ;;  %s155_s1 = inlined_call_operand.hbm [shape: f32[1,1], index: 1, kind: output, shape index: {}]  }
   0x1   :  { %7 = vsyncpa [#allocation5], 0  ;;  %s18_s8 = sshll.u32 %s154_s0, 4  ;;  %s134_s9 = smov [#allocation3]   ;;  %s19_s8 = int_to_ptr.hbm [resolvable:$true] %s18_s8 }
   0x2   :  { %s20_s10 = sshll.u32 %s134_s9, 4  ;;  %s135_s11 = smov 128   ;;  %s21_s10 = int_to_ptr.vmem [resolvable:$true] %s20_s10 }
   0x3   :  { %s136_s12 = smov 8  }
   0x4   :  { %26 = dma.hbm_to_vmem [thread:$0]  %s19_s8, 256, %s21_s10, [#allocation4], %s135_s11, %s135_s11, %s136_s12  }
   0x5   :  { %130 = dma.done.wait [#allocation4], 256  }
   0x6   :  { %131 = vsyncadd [#allocation4], 4294967040  ;;  %v41_v0 = vld [vmem:[#allocation3] sm:$0xff]  ;;  %v42_v1 = vld [vmem:[#allocation3 + $0x8] sm:$0xff]  ;;  %s75_s14 = sshll.u32 %s155_s1, 4  ;;  %s137_s16 = smov [#allocation6]   ;;  %s76_s14 = int_to_ptr.hbm [resolvable:$true] %s75_s14 }
   0x7   :  { %v43_v2 = vsub.f32 0.0, %v41_v0  ;;  %v44_v3 = vsub.f32 0.0, %v42_v1 }
   0x9   :  { %v45_v4 = vmax.f32 %v43_v2, 0.0  ;;  %v46_v5 = vmax.f32 %v44_v3, 0.0 }
   0xb   :  { %v58_v6 = vadd.f32 %v46_v5, %v45_v4 }
   0xd   :  { %59 = vadd.xlane.f32.xlu0 %v58_v6 }
  0x80   :  { %v60_v7 = vpop.xlane.xlu0 %59 }
  0x81   :  { %v61_v8 = vrot.slane %v60_v7, 4 }
  0x83   :  { %v62_v9 = vadd.f32 %v61_v8, %v60_v7 }
  0x85   :  { %v63_v10 = vrot.slane %v62_v9, 2 }
  0x87   :  { %v64_v11 = vadd.f32 %v63_v10, %v62_v9 }
  0x89   :  { %v65_v12 = vrot.slane %v64_v11, 1 }
  0x8b   :  { %v66_v13 = vadd.f32 %v65_v12, %v64_v11 }
  0x8d   :  { %88 = vpush %v66_v13 }
  0xbe   :  { %s89_s15 = spop %88 }
  0xbf   :  { %69 = sst [smem:[#allocation6]] %s89_s15 }
  0xc0   :  { %78 = dma.smem_to_hbm %s137_s16, 16, %s76_s14, [#allocation5]  }
  0xc1   :  { %132 = dma.done.wait [#allocation5], 16  }
  0xc2   :  { %133 = vsyncadd [#allocation5], 4294967280 }
  0xc3   :  { %83 = sfence }
  0xc4   :  { %84 = vsyncpa [#allocation4], 1 }
  0xc5   :  { %85 = vsyncpa [#allocation5], 1 }

</bundles_post_ra>
